<compile_context>
chip_gen: v6e
topology: v6e:2x2x1
jax: 0.10.0
libtpu: 0.0.40
codegen_flags: <defaults>
</compile_context>

<pallas_src>
import functools

import jax
import jax.numpy as jnp
from jax import lax
from jax.experimental import pallas as pl
from jax.experimental.pallas import tpu as pltpu


def _round_up(a: int, b: int) -> int:
    return (a + b - 1) // b * b


def _cdiv(a: int, b: int) -> int:
    return (a + b - 1) // b


def _encoder_kernel(x_ref, wlin_ref, w1s_ref, w1c_ref, w2_ref, avg_ref,
                    consts_ref, o_ref, *, eps, matmul_dtype):
    # x_ref: (tile, G*cin) f32 — G tokens packed along lanes.
    xp = x_ref[...]

    # Sinusoidal phases: block-diagonal W_lin keeps packed tokens independent.
    # (MXU pass; replaces the old per-channel VPU/XLU broadcast-MAC loop.)
    h = jnp.dot(xp, wlin_ref[...], preferred_element_type=jnp.float32)   # (tile, G*half)
    s = jnp.sin(h)
    c = jnp.cos(h)

    consts = consts_ref[...]                                             # (4, G*C)

    # MLP linear 1; concat(sin,cos) removed algebraically and the 1/sqrt(C/2)
    # scale is pre-folded into w1s/w1c in the wrapper.
    y = jnp.dot(s.astype(matmul_dtype), w1s_ref[...],
                preferred_element_type=jnp.float32)
    y = y + jnp.dot(c.astype(matmul_dtype), w1c_ref[...],
                    preferred_element_type=jnp.float32)
    y = y + consts[0:1, :]                                               # b1 (tiled)

    # SiLU.  TODO(synk): training-mode Dropout not implemented (eval identity).
    y = y * jax.nn.sigmoid(y)

    # MLP linear 2.
    y = jnp.dot(y.astype(matmul_dtype), w2_ref[...],
                preferred_element_type=jnp.float32)
    y = y + consts[1:2, :]                                               # b2 (tiled)

    # Per-token LayerNorm on the packed layout: the block-diagonal (1/C)
    # averaging matrix performs the per-group lane reduction on the MXU
    # (keeps the XLU free); two-pass centered variance.
    m = jnp.dot(y, avg_ref[...], preferred_element_type=jnp.float32)
    d = y - m
    v = jnp.dot(d * d, avg_ref[...], preferred_element_type=jnp.float32)
    out = d * lax.rsqrt(v + eps)
    out = out * consts[2:3, :] + consts[3:4, :]                          # gamma, beta
    o_ref[...] = out.astype(o_ref.dtype)


def sinusoidal_numerical_encoder(x, params, *, channels_out, tile_rows=4096,
                                 eps=1e-5, matmul_dtype=jnp.bfloat16,
                                 out_dtype=jnp.float32):
    """x: (..., channels_in) float32 -> (..., channels_out) out_dtype."""
    assert channels_out % 2 == 0
    wlin, w1, b1, w2, b2, ln_g, ln_b = params

    cin = x.shape[-1]
    lead = x.shape[:-1]
    C = channels_out
    half = C // 2
    scale = 1.0 / (C / 2) ** 0.5

    # Lane-packing factor: G tokens per 128-lane row (G=4 at C=32).
    G = (128 // C) if (C <= 128 and 128 % C == 0) else 1

    x2d = x.reshape(-1, cin).astype(jnp.float32)
    n_rows = x2d.shape[0]
    n_packed = _cdiv(n_rows, G)

    # Packed-row tile: large tiles amortize the ~0.35us/step pipeline overhead;
    # small inputs shrink the tile to keep >= 2 (preferably even) grid steps so
    # both v7x TensorCores get balanced work.
    tr_max = max(8, _round_up(max(tile_rows // G, 8), 8))
    if n_packed >= 2 * tr_max:
        tr = tr_max
        steps = _cdiv(n_packed, tr)
        if steps > 2 and steps % 2 == 1:
            tr_alt = _round_up(_cdiv(n_packed, steps + 1), 8)
            if tr_alt > 0 and _cdiv(n_packed, tr_alt) == steps + 1:
                tr = tr_alt
    else:
        tr = min(tr_max, max(8, _round_up(_cdiv(n_packed, 2), 8)))

    n_pad_packed = _round_up(max(n_packed, tr), tr)
    n_pad_rows = n_pad_packed * G
    if n_pad_rows != n_rows:
        x2d = jnp.pad(x2d, ((0, n_pad_rows - n_rows), (0, 0)))
    xp = x2d.reshape(n_pad_packed, G * cin)

    # Block-diagonal weights (kron with I_G keeps packed tokens independent).
    # The 1/sqrt(C/2) scale is folded into W1 in f32 before the MXU-dtype cast.
    eye = jnp.eye(G, dtype=jnp.float32)
    wlin_bd = jnp.kron(eye, wlin.astype(jnp.float32))                     # (G*cin, G*half) f32
    w1s_bd = jnp.kron(eye, w1[:half].astype(jnp.float32) * scale).astype(matmul_dtype)
    w1c_bd = jnp.kron(eye, w1[half:].astype(jnp.float32) * scale).astype(matmul_dtype)
    w2_bd = jnp.kron(eye, w2.astype(jnp.float32)).astype(matmul_dtype)    # (G*C, G*C)
    avg_bd = jnp.kron(eye, jnp.full((C, C), 1.0 / C, jnp.float32))        # (G*C, G*C) f32
    consts = jnp.concatenate(
        [jnp.tile(b1.reshape(1, C).astype(jnp.float32), (1, G)),
         jnp.tile(b2.reshape(1, C).astype(jnp.float32), (1, G)),
         jnp.tile(ln_g.reshape(1, C).astype(jnp.float32), (1, G)),
         jnp.tile(ln_b.reshape(1, C).astype(jnp.float32), (1, G))],
        axis=0)                                                           # (4, G*C) f32

    GC = G * C
    grid = (n_pad_packed // tr,)

    out_p = pl.pallas_call(
        functools.partial(_encoder_kernel, eps=eps, matmul_dtype=matmul_dtype),
        out_shape=jax.ShapeDtypeStruct((n_pad_packed, GC), out_dtype),
        grid_spec=pltpu.PrefetchScalarGridSpec(
            num_scalar_prefetch=0,
            grid=grid,
            in_specs=[
                pl.BlockSpec((tr, G * cin), lambda i: (i, 0)),            # packed x rows
                pl.BlockSpec((G * cin, G * half), lambda i: (0, 0)),      # W_lin (block-diag)
                pl.BlockSpec((G * half, GC), lambda i: (0, 0)),           # W1[:half] (bd, scaled)
                pl.BlockSpec((G * half, GC), lambda i: (0, 0)),           # W1[half:] (bd, scaled)
                pl.BlockSpec((GC, GC), lambda i: (0, 0)),                 # W2 (bd)
                pl.BlockSpec((GC, GC), lambda i: (0, 0)),                 # LayerNorm averaging mat
                pl.BlockSpec((4, GC), lambda i: (0, 0)),                  # b1/b2/gamma/beta
            ],
            out_specs=pl.BlockSpec((tr, GC), lambda i: (i, 0)),
        ),
        compiler_params=pltpu.CompilerParams(
            dimension_semantics=("parallel",)),
    )(xp, wlin_bd, w1s_bd, w1c_bd, w2_bd, avg_bd, consts)

    out2d = out_p.reshape(n_pad_rows, C)
    if n_pad_rows != n_rows:
        out2d = out2d[:n_rows]
    return out2d.reshape(*lead, C)


def _reference(x, params, *, channels_out, eps=1e-5, matmul_dtype=None):
    """f32 reference matching the PyTorch module.

    If matmul_dtype is given, the MLP weights are rounded exactly the way the
    kernel rounds them (scale folded into W1, then cast), so the comparison
    isolates kernel implementation error from the intentional weight
    quantization.
    """
    wlin, w1, b1, w2, b2, ln_g, ln_b = params
    C = channels_out
    half = C // 2
    scale = 1.0 / (C / 2) ** 0.5
    h = x @ wlin
    f = jnp.concatenate([jnp.sin(h), jnp.cos(h)], axis=-1)
    if matmul_dtype is not None:
        w1q = (w1 * scale).astype(matmul_dtype).astype(jnp.float32)
        w2q = w2.astype(matmul_dtype).astype(jnp.float32)
        y = f @ w1q + b1[0]
    else:
        y = (f * scale) @ w1 + b1[0]
        w2q = w2
    y = y * jax.nn.sigmoid(y)
    y = y @ w2q + b2[0]
    mean = jnp.mean(y, axis=-1, keepdims=True)
    var = jnp.mean(jnp.square(y - mean), axis=-1, keepdims=True)
    return (y - mean) * lax.rsqrt(var + eps) * ln_g[0] + ln_b[0]


def init_params(key, channels_in, channels_out, gamma=1.0):
    half = channels_out // 2
    k0, k1, k2, k3, k4 = jax.random.split(key, 5)
    # lin weight ~ N(0, gamma^-2); stored transposed (Cin, C/2)
    wlin = jax.random.normal(k0, (channels_in, half), jnp.float32) * (gamma ** -2)
    # MLP linears (stored transposed), deterministic small-random init
    w1 = jax.random.normal(k1, (channels_out, channels_out), jnp.float32) * 0.3
    b1 = jax.random.normal(k2, (1, channels_out), jnp.float32) * 0.1
    w2 = jax.random.normal(k3, (channels_out, channels_out), jnp.float32) * 0.3
    b2 = jax.random.normal(k4, (1, channels_out), jnp.float32) * 0.05
    # LayerNorm default init: gamma=1, beta=0
    ln_g = jnp.ones((1, channels_out), jnp.float32)
    ln_b = jnp.zeros((1, channels_out), jnp.float32)
    return (wlin, w1, b1, w2, b2, ln_g, ln_b)


if __name__ == "__main__":
    channels_in, channels_out = 4, 32
    mxu_dtype = jnp.bfloat16
    key = jax.random.PRNGKey(0)
    kx, kx2, kp = jax.random.split(key, 3)
    params = init_params(kp, channels_in, channels_out)

    # bf16 MXU operands with f32 accumulation -> compare against the
    # quantization-aware reference at a loose-ish tolerance.
    atol = rtol = 2e-2

    # Test 1: small input (single padded tile, exercises lane-pack G=4).
    x = jax.random.normal(kx, (2, 8, channels_in), jnp.float32)
    out = jax.block_until_ready(
        sinusoidal_numerical_encoder(x, params, channels_out=channels_out,
                                     matmul_dtype=mxu_dtype))
    ref = _reference(x, params, channels_out=channels_out, matmul_dtype=mxu_dtype)
    assert out.shape == (2, 8, channels_out)
    assert jnp.allclose(out, ref, atol=atol, rtol=rtol), "mismatch (test 1)"

    # Test 2: row count not a multiple of the pack factor or tile -> padding path.
    x2 = jax.random.normal(kx2, (3, 37, channels_in), jnp.float32)
    out2 = jax.block_until_ready(
        sinusoidal_numerical_encoder(x2, params, channels_out=channels_out,
                                     matmul_dtype=mxu_dtype))
    ref2 = _reference(x2, params, channels_out=channels_out, matmul_dtype=mxu_dtype)
    assert out2.shape == (3, 37, channels_out)
    assert jnp.allclose(out2, ref2, atol=atol, rtol=rtol), "mismatch (test 2)"

    # Test 3: bf16 output path (halves writeback HBM traffic).
    out3 = jax.block_until_ready(
        sinusoidal_numerical_encoder(x, params, channels_out=channels_out,
                                     matmul_dtype=mxu_dtype,
                                     out_dtype=jnp.bfloat16))
    assert out3.dtype == jnp.bfloat16 and out3.shape == (2, 8, channels_out)
    assert jnp.allclose(out3.astype(jnp.float32), ref, atol=5e-2, rtol=5e-2), \
        "mismatch (test 3)"

    print("KERNEL_OK")
</pallas_src>

<mosaic_0001>
module attributes {stable_mosaic.version = 11 : i64} {
  func.func @_encoder_kernel(%arg0: i32, %arg1: memref<8x16xf32, #tpu.memory_space<vmem>>, %arg2: memref<16x64xf32, #tpu.memory_space<vmem>>, %arg3: memref<64x128xbf16, #tpu.memory_space<vmem>>, %arg4: memref<64x128xbf16, #tpu.memory_space<vmem>>, %arg5: memref<128x128xbf16, #tpu.memory_space<vmem>>, %arg6: memref<128x128xf32, #tpu.memory_space<vmem>>, %arg7: memref<4x128xf32, #tpu.memory_space<vmem>>, %arg8: memref<8x128xf32, #tpu.memory_space<vmem>>) attributes {dimension_semantics = [#tpu.dimension_semantics<parallel>], iteration_bounds = array<i64: 1>, scalar_prefetch = 0 : i64, scratch_operands = 0 : i64, tpu.core_type = #tpu.core_type<tc>, window_params = [{transform_indices = @transform_0, window_bounds = array<i64: 8, 16>}, {pipeline_mode = #tpu.pipeline_mode<synchronous>, transform_indices = @transform_1, window_bounds = array<i64: 16, 64>}, {pipeline_mode = #tpu.pipeline_mode<synchronous>, transform_indices = @transform_2, window_bounds = array<i64: 64, 128>}, {pipeline_mode = #tpu.pipeline_mode<synchronous>, transform_indices = @transform_3, window_bounds = array<i64: 64, 128>}, {pipeline_mode = #tpu.pipeline_mode<synchronous>, transform_indices = @transform_4, window_bounds = array<i64: 128, 128>}, {pipeline_mode = #tpu.pipeline_mode<synchronous>, transform_indices = @transform_5, window_bounds = array<i64: 128, 128>}, {pipeline_mode = #tpu.pipeline_mode<synchronous>, transform_indices = @transform_6, window_bounds = array<i64: 4, 128>}, {transform_indices = @transform_7, window_bounds = array<i64: 8, 128>}]} {
    %c0 = arith.constant 0 : index
    %c0_0 = arith.constant 0 : index
    %0 = vector.load %arg1[%c0, %c0_0] : memref<8x16xf32, #tpu.memory_space<vmem>>, vector<8x16xf32>
    %c0_1 = arith.constant 0 : index
    %c0_2 = arith.constant 0 : index
    %1 = vector.load %arg2[%c0_1, %c0_2] : memref<16x64xf32, #tpu.memory_space<vmem>>, vector<16x64xf32>
    %cst = arith.constant dense<0.000000e+00> : vector<8x64xf32>
    %2 = tpu.matmul %0, %1, %cst {dimension_numbers = #tpu.dot_dimension_numbers<[1], [0], [0], [1], [0, 0, 1, 1], [], []>} : vector<8x16xf32>, vector<16x64xf32>, vector<8x64xf32> -> vector<8x64xf32>
    %3 = math.sin %2 : vector<8x64xf32>
    %4 = math.cos %2 : vector<8x64xf32>
    %c0_3 = arith.constant 0 : index
    %c0_4 = arith.constant 0 : index
    %5 = vector.load %arg7[%c0_3, %c0_4] : memref<4x128xf32, #tpu.memory_space<vmem>>, vector<4x128xf32>
    %6 = arith.truncf %3 : vector<8x64xf32> to vector<8x64xbf16>
    %c0_5 = arith.constant 0 : index
    %c0_6 = arith.constant 0 : index
    %7 = vector.load %arg3[%c0_5, %c0_6] : memref<64x128xbf16, #tpu.memory_space<vmem>>, vector<64x128xbf16>
    %cst_7 = arith.constant dense<0.000000e+00> : vector<8x128xf32>
    %8 = tpu.matmul %6, %7, %cst_7 {dimension_numbers = #tpu.dot_dimension_numbers<[1], [0], [0], [1], [0, 0, 1, 1], [], []>} : vector<8x64xbf16>, vector<64x128xbf16>, vector<8x128xf32> -> vector<8x128xf32>
    %9 = arith.truncf %4 : vector<8x64xf32> to vector<8x64xbf16>
    %c0_8 = arith.constant 0 : index
    %c0_9 = arith.constant 0 : index
    %10 = vector.load %arg4[%c0_8, %c0_9] : memref<64x128xbf16, #tpu.memory_space<vmem>>, vector<64x128xbf16>
    %cst_10 = arith.constant dense<0.000000e+00> : vector<8x128xf32>
    %11 = tpu.matmul %9, %10, %cst_10 {dimension_numbers = #tpu.dot_dimension_numbers<[1], [0], [0], [1], [0, 0, 1, 1], [], []>} : vector<8x64xbf16>, vector<64x128xbf16>, vector<8x128xf32> -> vector<8x128xf32>
    %12 = arith.addf %8, %11 : vector<8x128xf32>
    %13 = vector.extract_strided_slice %5 {offsets = [0, 0], sizes = [1, 128], strides = [1, 1]} : vector<4x128xf32> to vector<1x128xf32>
    %14 = vector.broadcast %13 : vector<1x128xf32> to vector<8x128xf32>
    %15 = arith.addf %12, %14 : vector<8x128xf32>
    %16 = arith.negf %15 : vector<8x128xf32>
    %17 = math.exp %16 : vector<8x128xf32>
    %cst_11 = arith.constant 1.000000e+00 : f32
    %18 = vector.broadcast %cst_11 : f32 to vector<8x128xf32>
    %19 = arith.addf %18, %17 : vector<8x128xf32>
    %20 = arith.divf %18, %19 : vector<8x128xf32>
    %21 = arith.mulf %15, %20 : vector<8x128xf32>
    %22 = arith.truncf %21 : vector<8x128xf32> to vector<8x128xbf16>
    %c0_12 = arith.constant 0 : index
    %c0_13 = arith.constant 0 : index
    %23 = vector.load %arg5[%c0_12, %c0_13] : memref<128x128xbf16, #tpu.memory_space<vmem>>, vector<128x128xbf16>
    %cst_14 = arith.constant dense<0.000000e+00> : vector<8x128xf32>
    %24 = tpu.matmul %22, %23, %cst_14 {dimension_numbers = #tpu.dot_dimension_numbers<[1], [0], [0], [1], [0, 0, 1, 1], [], []>} : vector<8x128xbf16>, vector<128x128xbf16>, vector<8x128xf32> -> vector<8x128xf32>
    %25 = vector.extract_strided_slice %5 {offsets = [1, 0], sizes = [1, 128], strides = [1, 1]} : vector<4x128xf32> to vector<1x128xf32>
    %26 = vector.broadcast %25 : vector<1x128xf32> to vector<8x128xf32>
    %27 = arith.addf %24, %26 : vector<8x128xf32>
    %c0_15 = arith.constant 0 : index
    %c0_16 = arith.constant 0 : index
    %28 = vector.load %arg6[%c0_15, %c0_16] : memref<128x128xf32, #tpu.memory_space<vmem>>, vector<128x128xf32>
    %cst_17 = arith.constant dense<0.000000e+00> : vector<8x128xf32>
    %29 = tpu.matmul %27, %28, %cst_17 {dimension_numbers = #tpu.dot_dimension_numbers<[1], [0], [0], [1], [0, 0, 1, 1], [], []>} : vector<8x128xf32>, vector<128x128xf32>, vector<8x128xf32> -> vector<8x128xf32>
    %30 = arith.subf %27, %29 : vector<8x128xf32>
    %31 = arith.mulf %30, %30 : vector<8x128xf32>
    %c0_18 = arith.constant 0 : index
    %c0_19 = arith.constant 0 : index
    %32 = vector.load %arg6[%c0_18, %c0_19] : memref<128x128xf32, #tpu.memory_space<vmem>>, vector<128x128xf32>
    %cst_20 = arith.constant dense<0.000000e+00> : vector<8x128xf32>
    %33 = tpu.matmul %31, %32, %cst_20 {dimension_numbers = #tpu.dot_dimension_numbers<[1], [0], [0], [1], [0, 0, 1, 1], [], []>} : vector<8x128xf32>, vector<128x128xf32>, vector<8x128xf32> -> vector<8x128xf32>
    %cst_21 = arith.constant 9.99999974E-6 : f32
    %34 = vector.broadcast %cst_21 : f32 to vector<8x128xf32>
    %35 = arith.addf %33, %34 : vector<8x128xf32>
    %36 = math.rsqrt %35 : vector<8x128xf32>
    %37 = arith.mulf %30, %36 : vector<8x128xf32>
    %38 = vector.extract_strided_slice %5 {offsets = [2, 0], sizes = [1, 128], strides = [1, 1]} : vector<4x128xf32> to vector<1x128xf32>
    %39 = vector.broadcast %38 : vector<1x128xf32> to vector<8x128xf32>
    %40 = arith.mulf %37, %39 : vector<8x128xf32>
    %41 = vector.extract_strided_slice %5 {offsets = [3, 0], sizes = [1, 128], strides = [1, 1]} : vector<4x128xf32> to vector<1x128xf32>
    %42 = vector.broadcast %41 : vector<1x128xf32> to vector<8x128xf32>
    %43 = arith.addf %40, %42 : vector<8x128xf32>
    %c0_22 = arith.constant 0 : index
    %c0_23 = arith.constant 0 : index
    %44 = vector.load %arg8[%c0_22, %c0_23] : memref<8x128xf32, #tpu.memory_space<vmem>>, vector<8x128xf32>
    tpu.vector_store %arg8[%c0_22, %c0_23], %43 {strides = array<i32>} : memref<8x128xf32, #tpu.memory_space<vmem>>, vector<8x128xf32>,
    return
  }
  func.func @transform_0(%arg0: i32) -> (i32, i32) {
    %c0_i32 = arith.constant 0 : i32
    %c0_i32_0 = arith.constant 0 : i32
    return %arg0, %c0_i32 : i32, i32
  }
  func.func @transform_1(%arg0: i32) -> (i32, i32) {
    %c0_i32 = arith.constant 0 : i32
    %c0_i32_0 = arith.constant 0 : i32
    %c0_i32_1 = arith.constant 0 : i32
    return %c0_i32, %c0_i32_0 : i32, i32
  }
  func.func @transform_2(%arg0: i32) -> (i32, i32) {
    %c0_i32 = arith.constant 0 : i32
    %c0_i32_0 = arith.constant 0 : i32
    %c0_i32_1 = arith.constant 0 : i32
    return %c0_i32, %c0_i32_0 : i32, i32
  }
  func.func @transform_3(%arg0: i32) -> (i32, i32) {
    %c0_i32 = arith.constant 0 : i32
    %c0_i32_0 = arith.constant 0 : i32
    %c0_i32_1 = arith.constant 0 : i32
    return %c0_i32, %c0_i32_0 : i32, i32
  }
  func.func @transform_4(%arg0: i32) -> (i32, i32) {
    %c0_i32 = arith.constant 0 : i32
    %c0_i32_0 = arith.constant 0 : i32
    %c0_i32_1 = arith.constant 0 : i32
    return %c0_i32, %c0_i32_0 : i32, i32
  }
  func.func @transform_5(%arg0: i32) -> (i32, i32) {
    %c0_i32 = arith.constant 0 : i32
    %c0_i32_0 = arith.constant 0 : i32
    %c0_i32_1 = arith.constant 0 : i32
    return %c0_i32, %c0_i32_0 : i32, i32
  }
  func.func @transform_6(%arg0: i32) -> (i32, i32) {
    %c0_i32 = arith.constant 0 : i32
    %c0_i32_0 = arith.constant 0 : i32
    %c0_i32_1 = arith.constant 0 : i32
    return %c0_i32, %c0_i32_0 : i32, i32
  }
  func.func @transform_7(%arg0: i32) -> (i32, i32) {
    %c0_i32 = arith.constant 0 : i32
    %c0_i32_0 = arith.constant 0 : i32
    return %arg0, %c0_i32 : i32, i32
  }
}

</mosaic_0001>

<bundles_post_ra>
// kernel: tpu_custom_call.1
= control target key start
LH: loop header
LB: loop body
LE: loop exit
PB: predicated region body
PF: predicated region fallthrough
CT: control target
= control target key end

     0   :  { %12 = vsyncpa [#allocation3], 0  ;;  %s1483_s0 = inlined_call_operand.hbm [shape: f32[8,16], index: 0, kind: input, shape index: {}]   ;;  %s1484_s1 = inlined_call_operand.hbm [shape: f32[16,64], index: 1, kind: input, shape index: {}]   ;;  %s1485_s2 = inlined_call_operand.hbm [shape: bf16[64,128], index: 2, kind: input, shape index: {}]   ;;  %s1486_s3 = inlined_call_operand.hbm [shape: bf16[64,128], index: 3, kind: input, shape index: {}]   ;;  %s1487_s4 = inlined_call_operand.hbm [shape: bf16[128,128], index: 4, kind: input, shape index: {}]   ;;  %s1488_s5 = inlined_call_operand.hbm [shape: f32[128,128], index: 5, kind: input, shape index: {}]   ;;  %s1489_s6 = inlined_call_operand.vmem [shape: f32[4,128], index: 6, kind: input, shape index: {}]   ;;  %s1490_s7 = inlined_call_operand.hbm [shape: f32[8,128], index: 7, kind: output, shape index: {}]  }
   0x1   :  { %13 = vsyncpa [#allocation6], 0 }
   0x2   :  { %14 = vsyncpa [#allocation9], 0 }
   0x3   :  { %15 = vsyncpa [#allocation12], 0 }
   0x4   :  { %16 = vsyncpa [#allocation4], 0  ;;  %s1260_s24 = smov [#allocation5]  }
   0x5   :  { %s32_s25 = sshll.u32 %s1260_s24, 4  ;;  %s33_s25 = int_to_ptr.vmem [resolvable:$true] %s32_s25 }
   0x6   :  { %s1118_s26 = scalar_lea.vmem %s33_s25, 256  ;;  %p1123_p1 = scmp.lt.s32.totalorder %s33_s25, %s33_s25 }
   0x7   :  { %p1119_p0 = scmp.ne.s32.totalorder %s33_s25, %s1118_s26  ;;  %p1124_p2 = scmp.lt.s32.totalorder %s1118_s26, %s1118_s26 }
   0x9   :  { %p1125_p3 = por %p1124_p2, %p1123_p1 }
   0xb   :  { %p1126_p4 = pnand %p1125_p3, %p1119_p0 }
   0xd   :  { %1129 = shalt.err (!%p1126_p4)
}
   0xe   :  { %s1261_s27 = smov 128   ;;  %s1262_s28 = smov 8  }
   0xf   :  { %38 = dma.hbm_to_vmem [thread:$0]  %s1484_s1, 256, %s33_s25, [#allocation6], %s1261_s27, %s1261_s27, %s1262_s28  }
  0x10   :  { %s1263_s8 = smov [#allocation8]   ;;  %s1264_s10 = smov [#allocation2]  }
  0x11   :  { %s56_s9 = sshll.u32 %s1263_s8, 4  ;;  %s23_s11 = sshll.u32 %s1264_s10, 4  ;;  %s57_s9 = int_to_ptr.vmem [resolvable:$true] %s56_s9  ;;  %s24_s11 = int_to_ptr.vmem [resolvable:$true] %s23_s11 }
  0x12   :  { %s1138_s12 = scalar_lea.vmem %s57_s9, 512  ;;  %p1143_p6 = scmp.lt.s32.totalorder %s57_s9, %s57_s9 }
  0x13   :  { %p1139_p5 = scmp.ne.s32.totalorder %s57_s9, %s1138_s12  ;;  %p1144_p7 = scmp.lt.s32.totalorder %s1138_s12, %s1138_s12 }
  0x15   :  { %p1145_p8 = por %p1144_p7, %p1143_p6 }
  0x17   :  { %p1146_p9 = pnand %p1145_p8, %p1139_p5 }
  0x19   :  { %1149 = shalt.err (!%p1146_p9)
}
  0x1a   :  { %s1265_s13 = smov 64   ;;  %s1266_s14 = smov 4  }
  0x1b   :  { %62 = dma.hbm_to_vmem [thread:$0]  %s1486_s3, 512, %s57_s9, [#allocation9], %s1265_s13, %s1265_s13, %s1266_s14  }
  0x1c   :  { %s1158_s1 = scalar_lea.vmem %s24_s11, 128  ;;  %p1163_p11 = scmp.lt.s32.totalorder %s24_s11, %s24_s11 }
  0x1d   :  { %p1159_p10 = scmp.ne.s32.totalorder %s24_s11, %s1158_s1  ;;  %p1164_p12 = scmp.lt.s32.totalorder %s1158_s1, %s1158_s1 }
  0x1f   :  { %p1165_p13 = por %p1164_p12, %p1163_p11 }
  0x21   :  { %p1166_p0 = pnand %p1165_p13, %p1159_p10 }
  0x23   :  { %1169 = shalt.err (!%p1166_p0)
}
  0x24   :  { %26 = dma.hbm_to_vmem [thread:$0]  %s1483_s0, 128, %s24_s11, [#allocation3]  }
  0x25   :  { %s1267_s19 = smov [#allocation7]   ;;  %s1268_s21 = smov [#allocation10]  }
  0x26   :  { %s44_s20 = sshll.u32 %s1267_s19, 4  ;;  %s68_s22 = sshll.u32 %s1268_s21, 4  ;;  %s45_s20 = int_to_ptr.vmem [resolvable:$true] %s44_s20  ;;  %s69_s22 = int_to_ptr.vmem [resolvable:$true] %s68_s22 }
  0x27   :  { %s1178_s23 = scalar_lea.vmem %s45_s20, 512  ;;  %p1183_p2 = scmp.lt.s32.totalorder %s45_s20, %s45_s20 }
  0x28   :  { %p1179_p1 = scmp.ne.s32.totalorder %s45_s20, %s1178_s23  ;;  %p1184_p3 = scmp.lt.s32.totalorder %s1178_s23, %s1178_s23 }
  0x2a   :  { %p1185_p4 = por %p1184_p3, %p1183_p2 }
  0x2c   :  { %p1186_p5 = pnand %p1185_p4, %p1179_p1 }
  0x2e   :  { %1189 = shalt.err (!%p1186_p5)
}
  0x2f   :  { %50 = dma.hbm_to_vmem [thread:$0]  %s1485_s2, 512, %s45_s20, [#allocation6], %s1265_s13, %s1265_s13, %s1266_s14  }
  0x30   :  { %s1198_s0 = scalar_lea.vmem %s69_s22, 1024  ;;  %p1203_p7 = scmp.lt.s32.totalorder %s69_s22, %s69_s22 }
  0x31   :  { %p1199_p6 = scmp.ne.s32.totalorder %s69_s22, %s1198_s0  ;;  %p1204_p8 = scmp.lt.s32.totalorder %s1198_s0, %s1198_s0 }
  0x33   :  { %p1205_p9 = por %p1204_p8, %p1203_p7 }
  0x35   :  { %p1206_p10 = pnand %p1205_p9, %p1199_p6 }
  0x37   :  { %1209 = shalt.err (!%p1206_p10)
}
  0x38   :  { %74 = dma.hbm_to_vmem [thread:$0]  %s1487_s4, 1024, %s69_s22, [#allocation9], %s1265_s13, %s1265_s13, %s1266_s14  }
  0x39   :  { %s1269_s29 = smov [#allocation11]  }
  0x3a   :  { %s80_s30 = sshll.u32 %s1269_s29, 4  ;;  %s81_s30 = int_to_ptr.vmem [resolvable:$true] %s80_s30 }
  0x3b   :  { %s1218_s8 = scalar_lea.vmem %s81_s30, 2048  ;;  %p1223_p12 = scmp.lt.s32.totalorder %s81_s30, %s81_s30 }
  0x3c   :  { %p1219_p11 = scmp.ne.s32.totalorder %s81_s30, %s1218_s8  ;;  %p1224_p13 = scmp.lt.s32.totalorder %s1218_s8, %s1218_s8 }
  0x3e   :  { %p1225_p0 = por %p1224_p13, %p1223_p12 }
  0x40   :  { %p1226_p1 = pnand %p1225_p0, %p1219_p11 }
  0x42   :  { %1229 = shalt.err (!%p1226_p1)
}
  0x43   :  { %86 = dma.hbm_to_vmem [thread:$0]  %s1488_s5, 2048, %s81_s30, [#allocation12], %s1261_s27, %s1261_s27, %s1262_s28  }
  0x44   :  { %1250 = dma.done.wait [#allocation3], 128  }
  0x45   :  { %1251 = vsyncadd [#allocation3], 4294967168 }
  0x46   :  { %1252 = dma.done.wait [#allocation6], 768  }
  0x47   :  { %1253 = vsyncadd [#allocation6], 4294966528 }
  0x48   :  { %1254 = dma.done.wait [#allocation9], 1536  }
  0x49   :  { %1255 = vsyncadd [#allocation9], 4294965760 }
  0x4a   :  { %1256 = dma.done.wait [#allocation12], 2048  }
  0x4b   :  { %1257 = vsyncadd [#allocation12], 4294965248  ;;  %v1270_v0 = vmov 0.0   ;;  %vm1271_vm0 = vmmov 0   ;;  %v110_v1 = vld [vmem:[#allocation5 + $0x8] sm:$0xff]  ;;  %v109_v2 = vld [vmem:[#allocation5] sm:$0xff] }
  0x4c   :  { %940 = vmatprep.subr.mxu0 %v1270_v0  ;;  %944 = vmatprep.mubr.msk.f32.mxu0 %vm1271_vm0, %v1270_v0  ;;  %v108_v3 = vld [vmem:[#allocation2] sm:$0xff]  ;;  %vm111_vm1 = vcmask 130048   ;;  %v1084_v4 = vld [vmem:[#allocation8 + $0x18] sm:$0xff]   ;;  %v1085_v5 = vld [vmem:[#allocation8 + $0x10] sm:$0xff]   ;;  %v1272_v20 = vmov 683565275  }
  0x4d   :  { %971 = vmatprep.subr.bf16.mxu1 %v1270_v0  ;;  %987 = vmatprep.mubr.msk.bf16.mxu1 %vm1271_vm0, %v1270_v0  ;;  %v1086_v6 = vld [vmem:[#allocation8 + $0x8] sm:$0xff]   ;;  %v1087_v7 = vld [vmem:[#allocation8] sm:$0xff]   ;;  %v1273_v22 = vmov 2475754826   ;;  %v1274_v25 = vmov 2131351028  }
  0x4e   :  { %941 = vmatpush3.msra.mxu0 %v110_v1  ;;  %v1275_v28 = vmov 2102212464   ;;  %v1276_v31 = vmov 920167782   ;;  %v1277_v34 = vmov 1326507024  }
  0x4f   :  { %942 = vmatprep.subr.mxu0 %v1270_v0  ;;  %vm435_vm15 = vcmask 523264  }
  0x50   :  { %943 = vmatpush3.msra.mxu0 %v109_v2 }
  0x51   :  { %945 = vmatmul.mubr.msk.f32.vlgmr.msra.gmra.mxu0 %vm111_vm1, %v108_v3  ;;  %947 = vmatprep.subr.bf16.mxu0 %v1270_v0 }
  0x52   :  { %955 = vmatprep.mubr.msk.bf16.mxu0 %vm1271_vm0, %v1270_v0  ;;  %948 = vmatpush3.bf16.msra.mxu0 %v1084_v4 }
  0x53   :  { %949 = vmatprep.subr.bf16.mxu0 %v1270_v0 }
  0x56   :  { %950 = vmatpush3.bf16.msra.mxu0 %v1085_v5 }
  0x57   :  { %951 = vmatprep.subr.bf16.mxu0 %v1270_v0 }
  0x5a   :  { %952 = vmatpush3.bf16.msra.mxu0 %v1086_v6 }
  0x5b   :  { %953 = vmatprep.subr.bf16.mxu0 %v1270_v0 }
  0x5e   :  { %954 = vmatpush3.bf16.msra.mxu0 %v1087_v7 }
  0x5f   :  { %959 = vmatprep.subr.bf16.mxu0 %v1270_v0 }
 0x111   :  { %v1366_v8 = vpop.f32.mrf.mxu0 }
 0x112   :  { %v188_v9 = vand.u32 2139095040, %v1366_v8  ;;  %v185_v14 = vand.u32 2147483647, %v1366_v8  ;;  %vm187_vm9 = vcmp.lt.s32.totalorder %v1366_v8, 0  ;;  %vm277_vm14 = vweird.f32 %v1366_v8 }
 0x113   :  { %v946_v10 = vpop.f32.mrf.mxu0 }
 0x114   :  { %v189_v11 = vshrl.u32 %v188_v9, 23  ;;  %v192_v17 = vand.u32 8388607, %v185_v14  ;;  %vm186_vm10 = vcmp.le.f32.partialorder %v185_v14, 0.7853982 }
 0x116   :  { %v857_v12 = vadd.s32 4294967169, %v189_v11  ;;  %v193_v36 = vor.u32 8388608, %v192_v17 }
 0x118   :  { %v195_v13 = vadd.s32 1, %v857_v12  ;;  %v233_v50 = vshll.u32 %v193_v36, 8 }
 0x11a   :  { %vm196_vm2 = vcmp.gt.s32.totalorder %v195_v13, 0 }
 0x11b   :  { %v197_v15 = vsel %vm196_vm2, %v195_v13, 0 }
 0x11c   :  { %v199_v16 = vand.u32 31, %v197_v15  ;;  %v198_v19 = vshrl.u32 %v197_v15, 5 }
 0x11e   :  { %v200_v18 = vsub.s32 32, %v199_v16  ;;  %v202_v21 = vshll.u32 %v1272_v20, %v199_v16  ;;  %v205_v23 = vshll.u32 %v1273_v22, %v199_v16  ;;  %v208_v27 = vshll.u32 %v1274_v25, %v199_v16 }
 0x11f   :  { %v211_v30 = vshll.u32 %v1275_v28, %v199_v16  ;;  %v214_v33 = vshll.u32 %v1276_v31, %v199_v16  ;;  %vm217_vm3 = vcmp.lt.s32.totalorder %v198_v19, 1  ;;  %vm220_vm4 = vcmp.lt.s32.totalorder %v198_v19, 4 }
 0x120   :  { %v203_v24 = vshrl.u32 %v1273_v22, %v200_v18  ;;  %v206_v26 = vshrl.u32 %v1274_v25, %v200_v18  ;;  %v209_v29 = vshrl.u32 %v1275_v28, %v200_v18  ;;  %v212_v32 = vshrl.u32 %v1276_v31, %v200_v18 }
 0x121   :  { %v215_v35 = vshrl.u32 %v1277_v34, %v200_v18  ;;  %v201_v45 = vshrl.u32 %v1272_v20, %v200_v18  ;;  %vm219_vm5 = vcmp.lt.s32.totalorder %v198_v19, 3  ;;  %vm218_vm6 = vcmp.lt.s32.totalorder %v198_v19, 2 }
 0x122   :  { %v204_v37 = vor.u32 %v203_v24, %v202_v21  ;;  %v207_v38 = vor.u32 %v206_v26, %v205_v23  ;;  %v210_v39 = vor.u32 %v209_v29, %v208_v27  ;;  %v213_v40 = vor.u32 %v212_v32, %v211_v30 }
 0x123   :  { %v216_v41 = vor.u32 %v215_v35, %v214_v33 }
 0x124   :  { %v222_v42 = vsel %vm220_vm4, %v210_v39, 2102212464  ;;  %v225_v43 = vsel %vm217_vm3, %v204_v37, %v207_v38  ;;  %v229_v44 = vsel %vm217_vm3, %v207_v38, %v210_v39  ;;  %v226_v46 = vsel %vm220_vm4, %v213_v40, 920167782 }
 0x125   :  { %v230_v47 = vsel %vm220_vm4, %v216_v41, 1326507024  ;;  %v227_v48 = vsel %vm219_vm5, %v210_v39, %v226_v46  ;;  %v221_v51 = vsel %vm217_vm3, %v201_v45, %v204_v37  ;;  %v223_v52 = vsel %vm219_vm5, %v207_v38, %v222_v42  ;;  %v1088_v39 = vld [vmem:[#allocation7 + $0x18] sm:$0xff]   ;;  %v1089_v42 = vld [vmem:[#allocation7 + $0x10] sm:$0xff]   ;;  %v1090_v45 = vld [vmem:[#allocation7 + $0x8] sm:$0xff]  }
 0x126   :  { %v231_v49 = vsel %vm219_vm5, %v213_v40, %v230_v47  ;;  %v228_v53 = vsel %vm218_vm6, %v225_v43, %v227_v48  ;;  %v224_v59 = vsel %vm218_vm6, %v221_v51, %v223_v52  ;;  %v1091_v47 = vld [vmem:[#allocation7] sm:$0xff]   ;;  %v1093_v51 = vld [vmem:[#allocation10 + $0x30] sm:$0xff]   ;;  %v1094_v52 = vld [vmem:[#allocation10 + $0x28] sm:$0xff]  }
 0x127   :  { %v232_v54 = vsel %vm218_vm6, %v229_v44, %v231_v49  ;;  %v1375_v57 = vmul.u32.u64.low %v233_v50, %v228_v53  ;;  %v1376_v58 = vmul.u32.u64.high %v233_v50, %v228_v53, %v1375_v57  ;;  %v240_v61 = vmul.u32 %v233_v50, %v224_v59  ;;  %v1096_v53 = vld [vmem:[#allocation10 + $0x18] sm:$0xff]   ;;  %v1415_v59 = vld [vmem:[#allocation11 + $0x68] sm:$0xff] }
 0x128   :  { %v1372_v55 = vmul.u32.u64.low %v233_v50, %v232_v54  ;;  %v1373_v56 = vmul.u32.u64.high %v233_v50, %v232_v54, %v1372_v55  ;;  %v1092_v50 = vld [vmem:[#allocation10 + $0x38] sm:$0xff]   ;;  %v1097_v54 = vld [vmem:[#allocation10 + $0x10] sm:$0xff]  }
 0x129   :  { %v243_v60 = vadd.s32 1, %v1376_v58  ;;  %972 = vmatpush3.bf16.msra.mxu1 %v1092_v50  ;;  %v1098_v55 = vld [vmem:[#allocation10 + $0x8] sm:$0xff]  }
 0x12a   :  { %vm242_vm7 = vc.u32 %v1373_v56, %v1375_v57  ;;  %v241_v11 = vadd.s32 %v1375_v57, %v1373_v56  ;;  %973 = vmatprep.subr.bf16.mxu1 %v1270_v0  ;;  %v1099_v56 = vld [vmem:[#allocation10] sm:$0xff]   ;;  %v1409_v57 = vld [vmem:[#allocation11 + $0x78] sm:$0xff] }
 0x12b   :  { %v244_v62 = vsel %vm242_vm7, %v243_v60, %v1376_v58  ;;  %v1411_v58 = vld [vmem:[#allocation11 + $0x70] sm:$0xff]  ;;  %v1419_v60 = vld [vmem:[#allocation11 + $0x60] sm:$0xff] }
 0x12c   :  { %v245_v63 = vadd.s32 %v244_v62, %v240_v61  ;;  %v1423_v61 = vld [vmem:[#allocation11 + $0x58] sm:$0xff]  ;;  %v1427_v62 = vld [vmem:[#allocation11 + $0x50] sm:$0xff] }
 0x12d   :  { %974 = vmatpush3.bf16.msra.mxu1 %v1093_v51 }
 0x12e   :  { %v246_v1 = vadd.s32 536870912, %v245_v63  ;;  %975 = vmatprep.subr.bf16.mxu1 %v1270_v0 }
 0x130   :  { %v247_v2 = vshrl.u32 %v246_v1, 30  ;;  %v675_v1 = vld [vmem:[#allocation11 + $0x40] sm:$0xff] }
 0x131   :  { %976 = vmatpush3.bf16.msra.mxu1 %v1094_v52 }
 0x132   :  { %v248_v3 = vshll.u32 %v247_v2, 30  ;;  %v271_v27 = vsub.s32 4, %v247_v2  ;;  %977 = vmatprep.subr.bf16.mxu1 %v1270_v0 }
 0x134   :  { %v249_v4 = vsub.s32 %v245_v63, %v248_v3  ;;  %v272_v28 = vsel %vm187_vm9, %v271_v27, %v247_v2  ;;  %v676_v63 = vld [vmem:[#allocation11 + $0x48] sm:$0xff]  ;;  %v674_v2 = vld [vmem:[#allocation11 + $0x38] sm:$0xff]  ;;  %v673_v3 = vld [vmem:[#allocation11 + $0x30] sm:$0xff] }
 0x135   :  { %v274_v29 = vsel %vm186_vm10, 0, %v272_v28 }
 0x136   :  { %v251_v5 = vsub.s32 0, %v249_v4  ;;  %v382_v30 = vand.u32 3, %v274_v29  ;;  %v278_v14 = vadd.s32 3, %v274_v29 }
 0x138   :  { %v858_v6 = vmin.u32 %v251_v5, %v249_v4  ;;  %vm387_vm11 = vcmp.eq.s32.totalorder %v382_v30, 2  ;;  %vm384_vm12 = vcmp.eq.s32.totalorder %v382_v30, 0  ;;  %vm383_vm13 = vcmp.lt.s32.totalorder %v382_v30, 2  ;;  %v671_v5 = vld [vmem:[#allocation11 + $0x20] sm:$0xff] }
 0x139   :  { %v279_v41 = vand.u32 3, %v278_v14 }
 0x13a   :  { %v253_v7 = vclz %v858_v6  ;;  %v670_v6 = vld [vmem:[#allocation11 + $0x18] sm:$0xff] }
 0x13b   :  { %vm281_vm1 = vcmp.eq.s32.totalorder %v279_v41, 0  ;;  %vm284_vm2 = vcmp.eq.s32.totalorder %v279_v41, 2  ;;  %vm280_vm3 = vcmp.lt.s32.totalorder %v279_v41, 2 }
 0x13c   :  { %v859_v9 = vadd.s32 4294967294, %v253_v7  ;;  %v669_v7 = vld [vmem:[#allocation11 + $0x10] sm:$0xff] }
 0x13e   :  { %vm860_vm8 = vcmp.lt.s32.totalorder %v859_v9, 0 }
 0x13f   :  { %v256_v10 = vsel %vm860_vm8, 0, %v859_v9 }
 0x140   :  { %v257_v12 = vsub.s32 32, %v256_v10  ;;  %v261_v13 = vsub.s32 4294967266, %v256_v10  ;;  %v258_v15 = vshll.u32 %v249_v4, %v256_v10  ;;  %v672_v4 = vld [vmem:[#allocation11 + $0x28] sm:$0xff] }
 0x142   :  { %v259_v16 = vshrl.u32 %v241_v11, %v257_v12  ;;  %v262_v17 = vadd.s32 127, %v261_v13  ;;  %v546_v11 = vlaneseq }
 0x144   :  { %v260_v18 = vor.u32 %v259_v16, %v258_v15  ;;  %v263_v19 = vshll.u32 %v262_v17, 23  ;;  %v1441_v15 = vshrl.u32 %v546_v11, 7  ;;  %v1447_v17 = vld [vmem:[%s1489_s6] sm:$0xf]  ;;  %s1278_s6 = smov [#allocation13]  }
 0x145   :  { %s844_s27 = sshll.u32 %s1278_s6, 4  ;;  %s845_s27 = int_to_ptr.vmem [resolvable:$true] %s844_s27 }
 0x146   :  { %v264_v20 = vor.u32 4788187, %v263_v19  ;;  %v267_v22 = vcvt.s32.f32 %v260_v18  ;;  %v548_v16 = vsub.s32 0, %v1441_v15  ;;  %s1230_s28 = scalar_lea.vmem %s845_s27, 128  ;;  %p1235_p3 = scmp.lt.s32.totalorder %s845_s27, %s845_s27 }
 0x147   :  { %p1231_p2 = scmp.ne.s32.totalorder %s845_s27, %s1230_s28  ;;  %p1236_p4 = scmp.lt.s32.totalorder %s1230_s28, %s1230_s28 }
 0x148   :  { %v265_v21 = vand.u32 2147483647, %v264_v20  ;;  %v549_v18 = vrot.slane %v1447_v17, %v548_v16 }
 0x149   :  { %p1237_p5 = por %p1236_p4, %p1235_p3 }
 0x14a   :  { %v268_v23 = vmul.f32 %v267_v22, %v265_v21 }
 0x14b   :  { %p1238_p6 = pnand %p1237_p5, %p1231_p2 }
 0x14c   :  { %v269_v24 = vxor.u32 2147483648, %v268_v23 }
 0x14e   :  { %v270_v25 = vsel %vm187_vm9, %v269_v24, %v268_v23 }
 0x14f   :  { %v273_v26 = vsel %vm186_vm10, %v1366_v8, %v270_v25  ;;  %v1095_v8 = vld [vmem:[#allocation10 + $0x20] sm:$0xff]  }
 0x150   :  { %1100 = vcosq.f32 %v273_v26  ;;  %978 = vmatpush3.bf16.msra.mxu1 %v1095_v8 }
 0x151   :  { %1102 = vsinq.f32 %v273_v26  ;;  %979 = vmatprep.subr.bf16.mxu1 %v1270_v0 }
 0x154   :  { %980 = vmatpush3.bf16.msra.mxu1 %v1096_v53 }
 0x155   :  { %981 = vmatprep.subr.bf16.mxu1 %v1270_v0 }
 0x158   :  { %982 = vmatpush3.bf16.msra.mxu1 %v1097_v54 }
 0x159   :  { %983 = vmatprep.subr.bf16.mxu1 %v1270_v0 }
 0x15c   :  { %984 = vmatpush3.bf16.msra.mxu1 %v1098_v55 }
 0x15d   :  { %v1101_v31 = vpop.eup %1100  ;;  %985 = vmatprep.subr.bf16.mxu1 %v1270_v0 }
 0x15e   :  { %v1103_v32 = vpop.eup %1102  ;;  %v285_v33 = vxor.u32 2147483648, %v1101_v31 }
 0x15f   :  { %v282_v34 = vxor.u32 2147483648, %v1103_v32 }
 0x160   :  { %v389_v35 = vsel %vm387_vm11, %v285_v33, %v1103_v32  ;;  %v286_v44 = vsel %vm284_vm2, %v285_v33, %v1103_v32  ;;  %986 = vmatpush3.bf16.msra.mxu1 %v1099_v56  ;;  %v667_v32 = vld [vmem:[#allocation11] sm:$0xff]  ;;  %v577_v33 = vsub.s32 1, %v1441_v15 }
 0x161   :  { %v386_v36 = vsel %vm384_vm12, %v1101_v31, %v282_v34  ;;  %v283_v43 = vsel %vm281_vm1, %v1101_v31, %v282_v34  ;;  %1026 = vmatprep.subr.mxu1 %v1270_v0  ;;  %v668_v31 = vld [vmem:[#allocation11 + $0x8] sm:$0xff] }
 0x162   :  { %v390_v37 = vsel %vm383_vm13, %v386_v36, %v389_v35  ;;  %v287_v46 = vsel %vm280_vm3, %v283_v43, %v286_v44  ;;  %v578_v34 = vrot.slane %v1447_v17, %v577_v33 }
 0x163   :  { %v391_v38 = vsel %vm277_vm14, nan, %v390_v37  ;;  %v288_v48 = vsel %vm277_vm14, nan, %v287_v46  ;;  %v834_v46 = vsub.s32 3, %v1441_v15 }
 0x164   :  { %v402_v40 = vpack.c.bf16 %v391_v38, %v391_v38  ;;  %v393_v49 = vpack.c.bf16 %v288_v48, %v288_v48 }
 0x165   :  { %v835_v50 = vrot.slane %v1447_v17, %v834_v46 }
 0x166   :  { %956 = vmatmul.mubr.msk.bf16.vlgmr.msra.gmra.mxu0 %vm435_vm15, %v402_v40 }
 0x167   :  { %960 = vmatpush3.bf16.msra.mxu0 %v1088_v39  ;;  %967 = vmatprep.mubr.msk.bf16.mxu0 %vm1271_vm0, %v1270_v0 }
 0x168   :  { %961 = vmatprep.subr.bf16.mxu0 %v1270_v0 }
 0x16b   :  { %962 = vmatpush3.bf16.msra.mxu0 %v1089_v42 }
 0x16c   :  { %963 = vmatprep.subr.bf16.mxu0 %v1270_v0 }
 0x16f   :  { %964 = vmatpush3.bf16.msra.mxu0 %v1090_v45  ;;  %v829_v45 = vsub.s32 2, %v1441_v15 }
 0x170   :  { %965 = vmatprep.subr.bf16.mxu0 %v1270_v0 }
 0x173   :  { %966 = vmatpush3.bf16.msra.mxu0 %v1091_v47  ;;  %v830_v47 = vrot.slane %v1447_v17, %v829_v45 }
 0x174   :  { %991 = vmatprep.subr.mxu0 %v1270_v0 }
 0x176   :  { %968 = vmatmul.mubr.msk.bf16.vlgmr.msra.gmra.mxu0 %vm435_vm15, %v393_v49 }
 0x177   :  { %1023 = vmatprep.mubr.msk.f32.mxu0 %vm1271_vm0, %v1270_v0  ;;  %992 = vmatpush3.msra.mxu0 %v1409_v57 }
 0x178   :  { %993 = vmatprep.subr.mxu0 %v1270_v0 }
 0x179   :  { %994 = vmatpush3.msra.mxu0 %v1411_v58 }
 0x17a   :  { %995 = vmatprep.subr.mxu0 %v1270_v0 }
 0x17b   :  { %996 = vmatpush3.msra.mxu0 %v1415_v59 }
 0x17c   :  { %997 = vmatprep.subr.mxu0 %v1270_v0 }
 0x17d   :  { %998 = vmatpush3.msra.mxu0 %v1419_v60 }
 0x17e   :  { %999 = vmatprep.subr.mxu0 %v1270_v0 }
 0x17f   :  { %1000 = vmatpush3.msra.mxu0 %v1423_v61 }
 0x180   :  { %1001 = vmatprep.subr.mxu0 %v1270_v0 }
 0x181   :  { %1002 = vmatpush3.msra.mxu0 %v1427_v62 }
 0x182   :  { %1003 = vmatprep.subr.mxu0 %v1270_v0 }
 0x183   :  { %1004 = vmatpush3.msra.mxu0 %v676_v63 }
 0x184   :  { %1005 = vmatprep.subr.mxu0 %v1270_v0 }
 0x185   :  { %1006 = vmatpush3.msra.mxu0 %v675_v1 }
 0x186   :  { %1007 = vmatprep.subr.mxu0 %v1270_v0 }
 0x187   :  { %1008 = vmatpush3.msra.mxu0 %v674_v2 }
 0x188   :  { %1009 = vmatprep.subr.mxu0 %v1270_v0 }
 0x189   :  { %1010 = vmatpush3.msra.mxu0 %v673_v3 }
 0x18a   :  { %1011 = vmatprep.subr.mxu0 %v1270_v0 }
 0x18b   :  { %1012 = vmatpush3.msra.mxu0 %v672_v4 }
 0x18c   :  { %1013 = vmatprep.subr.mxu0 %v1270_v0 }
 0x18d   :  { %1014 = vmatpush3.msra.mxu0 %v671_v5 }
 0x18e   :  { %1015 = vmatprep.subr.mxu0 %v1270_v0 }
 0x18f   :  { %1016 = vmatpush3.msra.mxu0 %v670_v6 }
 0x190   :  { %1017 = vmatprep.subr.mxu0 %v1270_v0 }
 0x191   :  { %1018 = vmatpush3.msra.mxu0 %v669_v7 }
 0x192   :  { %1019 = vmatprep.subr.mxu0 %v1270_v0 }
 0x193   :  { %1020 = vmatpush3.msra.mxu0 %v668_v31 }
 0x194   :  { %1021 = vmatprep.subr.mxu0 %v1270_v0 }
 0x195   :  { %1022 = vmatpush3.msra.mxu0 %v667_v32 }
 0x226   :  { %v473_v9 = vpop.f32.mrf.mxu0 }
 0x228   :  { %v957_v10 = vpop.f32.mrf.mxu0 }
 0x22a   :  { %v476_v12 = vpop.f32.mrf.mxu0 }
 0x22c   :  { %v958_v13 = vpop.f32.mrf.mxu0 }
 0x236   :  { %v540_v19 = vpop.f32.mrf.mxu0 }
 0x237   :  { %v541_v20 = vadd.f32 %v540_v19, %v473_v9 }
 0x238   :  { %v969_v21 = vpop.f32.mrf.mxu0 }
 0x239   :  { %v550_v22 = vadd.f32 %v549_v18, %v541_v20 }
 0x23a   :  { %v543_v23 = vpop.f32.mrf.mxu0 }
 0x23b   :  { %v875_v24 = vmul.f32 -1.442695, %v550_v22 }
 0x23c   :  { %v970_v25 = vpop.f32.mrf.mxu0 }
 0x23d   :  { %1104 = vpow2.f32 %v875_v24 }
 0x24a   :  { %v1105_v26 = vpop.eup %1104 }
 0x24b   :  { %v554_v27 = vadd.f32 1.0, %v1105_v26 }
 0x24d   :  { %1106 = vrcp.f32 %v554_v27 }
 0x25a   :  { %v1107_v28 = vpop.eup %1106 }
 0x25b   :  { %v557_v29 = vmul.f32 %v1107_v28, %v550_v22 }
 0x25d   :  { %v558_v30 = vpack.c.bf16 %v557_v29, %v557_v29 }
 0x25f   :  { %988 = vmatmul.mubr.bf16.vlgmr.msra.gmra.mxu1 %v558_v30 }
 0x260   :  { %1027 = vmatpush3.msra.mxu1 %v1409_v57  ;;  %1058 = vmatprep.mubr.msk.f32.mxu1 %vm1271_vm0, %v1270_v0 }
 0x261   :  { %1028 = vmatprep.subr.mxu1 %v1270_v0 }
 0x262   :  { %1029 = vmatpush3.msra.mxu1 %v1411_v58 }
 0x263   :  { %1030 = vmatprep.subr.mxu1 %v1270_v0 }
 0x264   :  { %1031 = vmatpush3.msra.mxu1 %v1415_v59 }
 0x265   :  { %1032 = vmatprep.subr.mxu1 %v1270_v0 }
 0x266   :  { %1033 = vmatpush3.msra.mxu1 %v1419_v60 }
 0x267   :  { %1034 = vmatprep.subr.mxu1 %v1270_v0 }
 0x268   :  { %1035 = vmatpush3.msra.mxu1 %v1423_v61 }
 0x269   :  { %1036 = vmatprep.subr.mxu1 %v1270_v0 }
 0x26a   :  { %1037 = vmatpush3.msra.mxu1 %v1427_v62 }
 0x26b   :  { %1038 = vmatprep.subr.mxu1 %v1270_v0 }
 0x26c   :  { %1039 = vmatpush3.msra.mxu1 %v676_v63 }
 0x26d   :  { %1040 = vmatprep.subr.mxu1 %v1270_v0 }
 0x26e   :  { %1041 = vmatpush3.msra.mxu1 %v675_v1 }
 0x26f   :  { %1042 = vmatprep.subr.mxu1 %v1270_v0 }
 0x270   :  { %1043 = vmatpush3.msra.mxu1 %v674_v2 }
 0x271   :  { %1044 = vmatprep.subr.mxu1 %v1270_v0 }
 0x272   :  { %1045 = vmatpush3.msra.mxu1 %v673_v3 }
 0x273   :  { %1046 = vmatprep.subr.mxu1 %v1270_v0 }
 0x274   :  { %1047 = vmatpush3.msra.mxu1 %v672_v4 }
 0x275   :  { %1048 = vmatprep.subr.mxu1 %v1270_v0 }
 0x276   :  { %1049 = vmatpush3.msra.mxu1 %v671_v5 }
 0x277   :  { %1050 = vmatprep.subr.mxu1 %v1270_v0 }
 0x278   :  { %1051 = vmatpush3.msra.mxu1 %v670_v6 }
 0x279   :  { %1052 = vmatprep.subr.mxu1 %v1270_v0 }
 0x27a   :  { %1053 = vmatpush3.msra.mxu1 %v669_v7 }
 0x27b   :  { %1054 = vmatprep.subr.mxu1 %v1270_v0 }
 0x27c   :  { %1055 = vmatpush3.msra.mxu1 %v668_v31 }
 0x27d   :  { %1056 = vmatprep.subr.mxu1 %v1270_v0 }
 0x27e   :  { %1057 = vmatpush3.msra.mxu1 %v667_v32 }
 0x31f   :  { %v661_v35 = vpop.f32.mrf.mxu1 }
 0x320   :  { %v662_v36 = vadd.f32 %v661_v35, %v578_v34 }
 0x321   :  { %v989_v14 = vpop.f32.mrf.mxu1 }
 0x322   :  { %1024 = vmatmul.mubr.f32.vlgmr.msra.gmra.mxu0 %v662_v36 }
 0x323   :  { %v664_v37 = vpop.f32.mrf.mxu1 }
 0x325   :  { %v990_v38 = vpop.f32.mrf.mxu1 }
 0x3e2   :  { %v749_v39 = vpop.f32.mrf.mxu0 }
 0x3e3   :  { %v753_v40 = vsub.f32 %v662_v36, %v749_v39 }
 0x3e4   :  { %v1025_v41 = vpop.f32.mrf.mxu0 }
 0x3e5   :  { %v754_v42 = vmul.f32 %v753_v40, %v753_v40 }
 0x3e7   :  { %1059 = vmatmul.mubr.f32.vlgmr.msra.gmra.mxu1 %v754_v42 }
 0x4a7   :  { %v821_v43 = vpop.f32.mrf.mxu1 }
 0x4a8   :  { %v822_v44 = vadd.f32 1e-05, %v821_v43 }
 0x4a9   :  { %v1060_v0 = vpop.f32.mrf.mxu1 }
 0x4aa   :  { %1108 = vrsqrt.f32 %v822_v44 }
 0x4b7   :  { %v1109_v48 = vpop.eup %1108 }
 0x4b8   :  { %v826_v49 = vmul.f32 %v1109_v48, %v753_v40 }
 0x4ba   :  { %v831_v51 = vmul.f32 %v830_v47, %v826_v49 }
 0x4bc   :  { %v836_v52 = vadd.f32 %v835_v50, %v831_v51 }
 0x4be   :  { %837 = vst [vmem:[#allocation13] sm:$0xff] %v836_v52 }
 0x4bf   :  { %1241 = shalt.err (!%p1238_p6)
}
 0x4c0   :  { %847 = dma.vmem_to_hbm [thread:$0]  %s845_s27, 128, %s1490_s7, [#allocation4]  }
 0x4c1   :  { %1258 = dma.done.wait [#allocation4], 128  }
 0x4c2   :  { %1259 = vsyncadd [#allocation4], 4294967168 }
 0x4c3   :  { %851 = vsyncpa [#allocation3], 1 }
 0x4c4   :  { %852 = vsyncpa [#allocation6], 1 }
 0x4c5   :  { %853 = vsyncpa [#allocation9], 1 }
 0x4c6   :  { %854 = vsyncpa [#allocation12], 1 }
 0x4c7   :  { %855 = vsyncpa [#allocation4], 1 }

</bundles_post_ra>
